<compile_context>
chip_gen: v7x
topology: tpu7x:2x2x1
jax: 0.10.0
libtpu: 0.0.40
codegen_flags: <defaults>
</compile_context>

<pallas_src>
import jax
import jax.numpy as jnp
from jax import lax
from jax.experimental import pallas as pl
from jax.experimental.pallas import tpu as pltpu


_LANE = 128    # vreg lane width (last dim)
_SUBLANE = 8   # f32 sublane count (second-to-last dim)


def _round_up(n, m):
    return ((n + m - 1) // m) * m


# --------------------------------------------------------------------------- #
# Kernel
# --------------------------------------------------------------------------- #
def ann_pinn_kernel(x_ref, w_in_ref, b_in_ref, w_h_ref, b_h_ref,
                    w_out_t_ref, b_out_ref, o_ref):
    """One batch tile: input FMA + hidden bf16-MXU/tanh chain + lane-reduce out."""
    tb = x_ref.shape[0]
    num_hidden = w_h_ref.shape[0]
    out_dim = o_ref.shape[1]
    bf16, f32 = jnp.bfloat16, jnp.float32

    # ---- Input layer: tiny contraction (input_dim ~ 2) -> VPU broadcast-FMA.
    x = x_ref[...]                          # (TB, D_in) f32
    w_in = w_in_ref[...]                    # (D_in, Hp) f32 (tiny)
    s = b_in_ref[...]                       # (1, Hp), broadcasts over rows
    for d in range(w_in.shape[0]):          # static unroll, input_dim is tiny
        s = s + x[:, d:d + 1] * w_in[d:d + 1, :]
    h = jnp.tanh(s)                         # (TB, Hp) f32

    # ---- Split the tile into two independent row-halves so the MXU matmul of
    # one half overlaps the EUP tanh of the other (different VLIW slots).
    if tb % 16 == 0 and tb >= 16:
        part = tb // 2                      # sublane-aligned (multiple of 8)
        parts = [h[:part], h[part:]]
    else:
        part = tb
        parts = [h]

    def hidden_layer(hi, w_l, b_l):
        # bf16 MXU operands, f32 accumulation; bias add + tanh stay f32.
        z = jnp.dot(hi.astype(bf16), w_l, preferred_element_type=f32) + b_l
        return jnp.tanh(z)

    if num_hidden <= 4:
        # Short stack: static unroll keeps the whole chain LLO-visible.
        for l in range(num_hidden):
            w_l = w_h_ref[l]                # (Hp, Hp) bf16, one layer live
            b_l = b_h_ref[l]                # (1, Hp)  f32, broadcast-shaped
            parts = [hidden_layer(hi, w_l, b_l) for hi in parts]
    else:
        # Deep stack: fori_loop bounds live ranges to one (Hp, Hp) layer.
        def body(l, carry):
            w_l = w_h_ref[l]
            b_l = b_h_ref[l]
            return tuple(hidden_layer(hi, w_l, b_l) for hi in carry)
        parts = list(lax.fori_loop(0, num_hidden, body, tuple(parts)))

    # ---- Output layer: output_dim is tiny (e.g. 1), so use a VPU multiply +
    # XLU lane-reduce and store a narrow (part, out_dim) block instead of a
    # 128-lane padded MXU matmul + 128x-amplified f32 writeback.
    w_out_t = w_out_t_ref[...]              # (out_dim, Hp) f32 (row j = col j of w_out)
    b_out = b_out_ref[...]                  # (1, out_dim)  f32
    for i, hi in enumerate(parts):
        cols = [jnp.sum(hi * w_out_t[j:j + 1, :], axis=-1, keepdims=True)
                for j in range(out_dim)]    # static unroll, out_dim is tiny
        out_i = (cols[0] if out_dim == 1 else jnp.concatenate(cols, axis=-1)) + b_out
        o_ref[i * part:(i + 1) * part, :] = out_i.astype(o_ref.dtype)


# --------------------------------------------------------------------------- #
# Parameter preparation (call ONCE, not per forward)
# --------------------------------------------------------------------------- #
def pad_params(params):
    """Lane-pad feature dims and pre-cast MXU weights to bf16 — hoisted out of
    the forward so the padding/casting cost is paid once, not per call."""
    w_in, b_in, w_h, b_h, w_out, b_out = params
    input_dim, hidden_dim = w_in.shape
    num_hidden = w_h.shape[0]
    output_dim = w_out.shape[1]
    hp = _round_up(hidden_dim, _LANE)
    f32, bf16 = jnp.float32, jnp.bfloat16

    w_in_p = jnp.zeros((input_dim, hp), f32).at[:, :hidden_dim].set(w_in.astype(f32))
    b_in_p = jnp.zeros((1, hp), f32).at[:, :hidden_dim].set(
        b_in.reshape(1, hidden_dim).astype(f32))
    # Hidden weights are the only MXU operands -> bf16 storage (halves resident
    # VMEM, single-pass MXU). Padding is inert: zero weights/biases, tanh(0)=0.
    w_h_p = jnp.zeros((num_hidden, hp, hp), bf16).at[:, :hidden_dim, :hidden_dim].set(
        w_h.astype(bf16))
    b_h_p = jnp.zeros((num_hidden, 1, hp), f32).at[:, 0, :hidden_dim].set(
        b_h.reshape(num_hidden, hidden_dim).astype(f32))
    # Output layer runs on VPU/XLU (no MXU), so keep f32; stored transposed so
    # row j of w_out_t is column j of the original weight.
    w_out_t_p = jnp.zeros((output_dim, hp), f32).at[:, :hidden_dim].set(
        w_out.astype(f32).T)
    b_out_p = b_out.reshape(1, output_dim).astype(f32)
    return (w_in_p, b_in_p, w_h_p, b_h_p, w_out_t_p, b_out_p)


# --------------------------------------------------------------------------- #
# Forward wrapper
# --------------------------------------------------------------------------- #
def ann_pinn_forward(x, padded_params, *, block_batch=None):
    """Batch-tiled Pallas forward. `padded_params` must come from pad_params()."""
    w_in_p, b_in_p, w_h_p, b_h_p, w_out_t_p, b_out_p = padded_params
    batch, input_dim = x.shape
    hp = w_in_p.shape[1]
    num_hidden = w_h_p.shape[0]
    output_dim = w_out_t_p.shape[0]
    f32 = jnp.float32

    # Batch tile: multiple of 8 (f32 sublanes); default keeps the grid length
    # >= 2 (both v7x TensorCores get work) and caps the tile at 1024 rows so
    # per-step overhead is amortised while x/out tiles stay tiny vs VMEM.
    if block_batch is None:
        block_batch = min(1024, _round_up(max(pl.cdiv(batch, 2), _SUBLANE), _SUBLANE))
    block_batch = max(_SUBLANE, _round_up(block_batch, _SUBLANE))
    b_total = _round_up(batch, block_batch)
    x_p = jnp.zeros((b_total, input_dim), f32).at[:batch].set(x.astype(f32))

    grid = (b_total // block_batch,)

    const2 = lambda i: (0, 0)
    const3 = lambda i: (0, 0, 0)
    in_specs = [
        pl.BlockSpec((block_batch, input_dim), lambda i: (i, 0)),   # x tile (per step)
        pl.BlockSpec((input_dim, hp), const2),                      # w_in   (resident)
        pl.BlockSpec((1, hp), const2),                              # b_in   (resident)
        pl.BlockSpec((num_hidden, hp, hp), const3),                 # w_h    (resident, bf16)
        pl.BlockSpec((num_hidden, 1, hp), const3),                  # b_h    (resident)
        pl.BlockSpec((output_dim, hp), const2),                     # w_out^T(resident)
        pl.BlockSpec((1, output_dim), const2),                      # b_out  (resident)
    ]
    # Narrow output block (full last dim = output_dim): no 128x write amplification.
    out_spec = pl.BlockSpec((block_batch, output_dim), lambda i: (i, 0))

    f32_size, bf16_size = 4, 2
    weight_bytes = ((w_in_p.size + b_in_p.size + b_h_p.size + w_out_t_p.size
                     + b_out_p.size) * f32_size + w_h_p.size * bf16_size)
    io_tile_bytes = block_batch * (input_dim + output_dim) * f32_size
    act_bytes = 6 * block_batch * hp * f32_size
    # Constant-index inputs are still double-buffered by the auto pipeliner;
    # negligible here, but it is what breaks v7x's 64 MiB/core first if
    # hidden_dim / num_hidden scale up.
    # TODO(synk): switch the constant-index specs to pipeline_mode=pl.Buffered(1)
    # if 2 * weight_bytes ever approaches the per-core VMEM budget.
    assert 2 * weight_bytes + 2 * io_tile_bytes + act_bytes < (48 << 20), (
        "resident weights too large for single-kernel VMEM residency; "
        "tile hidden_dim / layers or single-buffer the weight specs")
    vmem_limit = int(min(64 << 20,
                         max(16 << 20,
                             2 * (weight_bytes + io_tile_bytes) + act_bytes + (4 << 20))))

    flops = 2 * b_total * (input_dim * hp + num_hidden * hp * hp + hp * output_dim)
    transcendentals = b_total * hp * (num_hidden + 1)
    bytes_accessed = (x_p.size + b_total * output_dim) * f32_size + weight_bytes

    out_padded = pl.pallas_call(
        ann_pinn_kernel,
        out_shape=jax.ShapeDtypeStruct((b_total, output_dim), f32),
        grid=grid,
        in_specs=in_specs,
        out_specs=out_spec,
        compiler_params=pltpu.CompilerParams(
            dimension_semantics=("parallel",),
            vmem_limit_bytes=vmem_limit,
        ),
        cost_estimate=pl.CostEstimate(
            flops=int(flops),
            transcendentals=int(transcendentals),
            bytes_accessed=int(bytes_accessed),
        ),
    )(x_p, w_in_p, b_in_p, w_h_p, b_h_p, w_out_t_p, b_out_p)

    # Strip batch padding (padded rows hold bias-driven garbage by design).
    return out_padded[:batch]


# --------------------------------------------------------------------------- #
# Init + references
# --------------------------------------------------------------------------- #
def init_params(key, input_dim, hidden_dim, output_dim, num_hidden_layers):
    """Deterministic init mirroring nn.Linear's U(-1/sqrt(fan_in), 1/sqrt(fan_in))."""
    ks = jax.random.split(key, 6)

    def uniform(k, shape, fan_in):
        bound = 1.0 / jnp.sqrt(jnp.float32(fan_in))
        return jax.random.uniform(k, shape, jnp.float32, -bound, bound)

    w_in = uniform(ks[0], (input_dim, hidden_dim), input_dim)
    b_in = uniform(ks[1], (1, hidden_dim), input_dim)
    w_h = uniform(ks[2], (num_hidden_layers, hidden_dim, hidden_dim), hidden_dim)
    b_h = uniform(ks[3], (num_hidden_layers, hidden_dim), hidden_dim)
    w_out = uniform(ks[4], (hidden_dim, output_dim), hidden_dim)
    b_out = uniform(ks[5], (1, output_dim), hidden_dim)
    return (w_in, b_in, w_h, b_h, w_out, b_out)


def reference_forward(x, params):
    """Pure-JAX f32 reference matching the PyTorch forward."""
    w_in, b_in, w_h, b_h, w_out, b_out = params
    h = jnp.tanh(x @ w_in + b_in)
    for l in range(w_h.shape[0]):
        h = jnp.tanh(h @ w_h[l] + b_h[l][None, :])
    return h @ w_out + b_out


def reference_forward_matched(x, params):
    """Reference with the kernel's numerics: bf16 MXU operands on the hidden
    layers (f32 accumulation), full-precision f32 everywhere else."""
    w_in, b_in, w_h, b_h, w_out, b_out = params
    hi = lax.Precision.HIGHEST
    h = jnp.tanh(jnp.dot(x, w_in, precision=hi) + b_in)
    for l in range(w_h.shape[0]):
        z = jnp.dot(h.astype(jnp.bfloat16), w_h[l].astype(jnp.bfloat16),
                    preferred_element_type=jnp.float32)
        h = jnp.tanh(z + b_h[l][None, :])
    return jnp.dot(h, w_out, precision=hi) + b_out


# --------------------------------------------------------------------------- #
if __name__ == "__main__":
    # Small PINN-like shapes: x = (batch, input_dim) collocation points (t, x).
    batch = 64
    input_dim = 2
    hidden_dim = 32
    output_dim = 1
    num_hidden_layers = 3

    key = jax.random.PRNGKey(0)
    k_x, k_p = jax.random.split(key)
    x = jax.random.normal(k_x, (batch, input_dim), jnp.float32)
    params = init_params(k_p, input_dim, hidden_dim, output_dim, num_hidden_layers)

    padded = pad_params(params)            # hoisted: pad / bf16-cast once
    out = ann_pinn_forward(x, padded)      # default tiling -> grid of 2 tiles
    out = jax.block_until_ready(out)

    assert out.shape == (batch, output_dim)

    # Tight check vs a reference with matched (bf16-MXU) numerics.
    ref_m = reference_forward_matched(x, params)
    assert jnp.allclose(out, ref_m, atol=2e-3, rtol=2e-3), (
        f"mismatch vs matched reference: {float(jnp.max(jnp.abs(out - ref_m)))}")
    # Looser check vs the exact-f32 PyTorch-equivalent forward (bf16 operand
    # quantization on the hidden layers is the only difference).
    ref_f = reference_forward(x, params)
    assert jnp.allclose(out, ref_f, atol=5e-2, rtol=5e-2), (
        f"mismatch vs f32 reference: {float(jnp.max(jnp.abs(out - ref_f)))}")

    print("KERNEL_OK")
</pallas_src>

<mosaic_0001>
module attributes {stable_mosaic.version = 11 : i64} {
  func.func @ann_pinn_kernel(%arg0: i32, %arg1: memref<32x2xf32, #tpu.memory_space<vmem>>, %arg2: memref<2x128xf32, #tpu.memory_space<vmem>>, %arg3: memref<1x128xf32, #tpu.memory_space<vmem>>, %arg4: memref<3x128x128xbf16, #tpu.memory_space<vmem>>, %arg5: memref<3x1x128xf32, #tpu.memory_space<vmem>>, %arg6: memref<1x128xf32, #tpu.memory_space<vmem>>, %arg7: memref<1x1xf32, #tpu.memory_space<vmem>>, %arg8: memref<32x1xf32, #tpu.memory_space<vmem>>) attributes {dimension_semantics = [#tpu.dimension_semantics<parallel>], iteration_bounds = array<i64: 2>, scalar_prefetch = 0 : i64, scratch_operands = 0 : i64, tpu.core_type = #tpu.core_type<tc>, window_params = [{transform_indices = @transform_0, window_bounds = array<i64: 32, 2>}, {pipeline_mode = #tpu.pipeline_mode<synchronous>, transform_indices = @transform_1, window_bounds = array<i64: 2, 128>}, {pipeline_mode = #tpu.pipeline_mode<synchronous>, transform_indices = @transform_2, window_bounds = array<i64: 1, 128>}, {pipeline_mode = #tpu.pipeline_mode<synchronous>, transform_indices = @transform_3, window_bounds = array<i64: 3, 128, 128>}, {pipeline_mode = #tpu.pipeline_mode<synchronous>, transform_indices = @transform_4, window_bounds = array<i64: 3, 1, 128>}, {pipeline_mode = #tpu.pipeline_mode<synchronous>, transform_indices = @transform_5, window_bounds = array<i64: 1, 128>}, {pipeline_mode = #tpu.pipeline_mode<synchronous>, transform_indices = @transform_6, window_bounds = array<i64: 1, 1>}, {transform_indices = @transform_7, window_bounds = array<i64: 32, 1>}]} {
    %c0 = arith.constant 0 : index
    %c0_0 = arith.constant 0 : index
    %0 = vector.load %arg1[%c0, %c0_0] : memref<32x2xf32, #tpu.memory_space<vmem>>, vector<32x2xf32>
    %c0_1 = arith.constant 0 : index
    %c0_2 = arith.constant 0 : index
    %1 = vector.load %arg2[%c0_1, %c0_2] : memref<2x128xf32, #tpu.memory_space<vmem>>, vector<2x128xf32>
    %c0_3 = arith.constant 0 : index
    %c0_4 = arith.constant 0 : index
    %2 = vector.load %arg3[%c0_3, %c0_4] : memref<1x128xf32, #tpu.memory_space<vmem>>, vector<1x128xf32>
    %3 = vector.extract_strided_slice %0 {offsets = [0, 0], sizes = [32, 1], strides = [1, 1]} : vector<32x2xf32> to vector<32x1xf32>
    %4 = vector.extract_strided_slice %1 {offsets = [0, 0], sizes = [1, 128], strides = [1, 1]} : vector<2x128xf32> to vector<1x128xf32>
    %5 = vector.broadcast %3 : vector<32x1xf32> to vector<32x128xf32>
    %6 = vector.broadcast %4 : vector<1x128xf32> to vector<32x128xf32>
    %7 = arith.mulf %5, %6 : vector<32x128xf32>
    %8 = vector.broadcast %2 : vector<1x128xf32> to vector<32x128xf32>
    %9 = arith.addf %8, %7 : vector<32x128xf32>
    %10 = vector.extract_strided_slice %0 {offsets = [0, 1], sizes = [32, 1], strides = [1, 1]} : vector<32x2xf32> to vector<32x1xf32>
    %11 = vector.extract_strided_slice %1 {offsets = [1, 0], sizes = [1, 128], strides = [1, 1]} : vector<2x128xf32> to vector<1x128xf32>
    %12 = vector.broadcast %10 : vector<32x1xf32> to vector<32x128xf32>
    %13 = vector.broadcast %11 : vector<1x128xf32> to vector<32x128xf32>
    %14 = arith.mulf %12, %13 : vector<32x128xf32>
    %15 = arith.addf %9, %14 : vector<32x128xf32>
    %16 = math.tanh %15 : vector<32x128xf32>
    %17 = vector.extract_strided_slice %16 {offsets = [0, 0], sizes = [16, 128], strides = [1, 1]} : vector<32x128xf32> to vector<16x128xf32>
    %18 = vector.extract_strided_slice %16 {offsets = [16, 0], sizes = [16, 128], strides = [1, 1]} : vector<32x128xf32> to vector<16x128xf32>
    %c0_5 = arith.constant 0 : index
    %c0_6 = arith.constant 0 : index
    %c0_7 = arith.constant 0 : index
    %19 = vector.load %arg4[%c0_5, %c0_6, %c0_7] : memref<3x128x128xbf16, #tpu.memory_space<vmem>>, vector<1x128x128xbf16>
    %20 = vector.shape_cast %19 : vector<1x128x128xbf16> to vector<128x128xbf16>
    %c0_8 = arith.constant 0 : index
    %c0_9 = arith.constant 0 : index
    %c0_10 = arith.constant 0 : index
    %21 = vector.load %arg5[%c0_8, %c0_9, %c0_10] : memref<3x1x128xf32, #tpu.memory_space<vmem>>, vector<1x1x128xf32>
    %22 = vector.shape_cast %21 : vector<1x1x128xf32> to vector<1x128xf32>
    %23 = arith.truncf %17 : vector<16x128xf32> to vector<16x128xbf16>
    %cst = arith.constant dense<0.000000e+00> : vector<16x128xf32>
    %24 = tpu.matmul %23, %20, %cst {dimension_numbers = #tpu.dot_dimension_numbers<[1], [0], [0], [1], [0, 0, 1, 1], [], []>} : vector<16x128xbf16>, vector<128x128xbf16>, vector<16x128xf32> -> vector<16x128xf32>
    %25 = vector.broadcast %22 : vector<1x128xf32> to vector<16x128xf32>
    %26 = arith.addf %24, %25 : vector<16x128xf32>
    %27 = math.tanh %26 : vector<16x128xf32>
    %28 = arith.truncf %18 : vector<16x128xf32> to vector<16x128xbf16>
    %cst_11 = arith.constant dense<0.000000e+00> : vector<16x128xf32>
    %29 = tpu.matmul %28, %20, %cst_11 {dimension_numbers = #tpu.dot_dimension_numbers<[1], [0], [0], [1], [0, 0, 1, 1], [], []>} : vector<16x128xbf16>, vector<128x128xbf16>, vector<16x128xf32> -> vector<16x128xf32>
    %30 = vector.broadcast %22 : vector<1x128xf32> to vector<16x128xf32>
    %31 = arith.addf %29, %30 : vector<16x128xf32>
    %32 = math.tanh %31 : vector<16x128xf32>
    %c1 = arith.constant 1 : index
    %c0_12 = arith.constant 0 : index
    %c0_13 = arith.constant 0 : index
    %33 = vector.load %arg4[%c1, %c0_12, %c0_13] : memref<3x128x128xbf16, #tpu.memory_space<vmem>>, vector<1x128x128xbf16>
    %34 = vector.shape_cast %33 : vector<1x128x128xbf16> to vector<128x128xbf16>
    %c1_14 = arith.constant 1 : index
    %c0_15 = arith.constant 0 : index
    %c0_16 = arith.constant 0 : index
    %35 = vector.load %arg5[%c1_14, %c0_15, %c0_16] : memref<3x1x128xf32, #tpu.memory_space<vmem>>, vector<1x1x128xf32>
    %36 = vector.shape_cast %35 : vector<1x1x128xf32> to vector<1x128xf32>
    %37 = arith.truncf %27 : vector<16x128xf32> to vector<16x128xbf16>
    %cst_17 = arith.constant dense<0.000000e+00> : vector<16x128xf32>
    %38 = tpu.matmul %37, %34, %cst_17 {dimension_numbers = #tpu.dot_dimension_numbers<[1], [0], [0], [1], [0, 0, 1, 1], [], []>} : vector<16x128xbf16>, vector<128x128xbf16>, vector<16x128xf32> -> vector<16x128xf32>
    %39 = vector.broadcast %36 : vector<1x128xf32> to vector<16x128xf32>
    %40 = arith.addf %38, %39 : vector<16x128xf32>
    %41 = math.tanh %40 : vector<16x128xf32>
    %42 = arith.truncf %32 : vector<16x128xf32> to vector<16x128xbf16>
    %cst_18 = arith.constant dense<0.000000e+00> : vector<16x128xf32>
    %43 = tpu.matmul %42, %34, %cst_18 {dimension_numbers = #tpu.dot_dimension_numbers<[1], [0], [0], [1], [0, 0, 1, 1], [], []>} : vector<16x128xbf16>, vector<128x128xbf16>, vector<16x128xf32> -> vector<16x128xf32>
    %44 = vector.broadcast %36 : vector<1x128xf32> to vector<16x128xf32>
    %45 = arith.addf %43, %44 : vector<16x128xf32>
    %46 = math.tanh %45 : vector<16x128xf32>
    %c2 = arith.constant 2 : index
    %c0_19 = arith.constant 0 : index
    %c0_20 = arith.constant 0 : index
    %47 = vector.load %arg4[%c2, %c0_19, %c0_20] : memref<3x128x128xbf16, #tpu.memory_space<vmem>>, vector<1x128x128xbf16>
    %48 = vector.shape_cast %47 : vector<1x128x128xbf16> to vector<128x128xbf16>
    %c2_21 = arith.constant 2 : index
    %c0_22 = arith.constant 0 : index
    %c0_23 = arith.constant 0 : index
    %49 = vector.load %arg5[%c2_21, %c0_22, %c0_23] : memref<3x1x128xf32, #tpu.memory_space<vmem>>, vector<1x1x128xf32>
    %50 = vector.shape_cast %49 : vector<1x1x128xf32> to vector<1x128xf32>
    %51 = arith.truncf %41 : vector<16x128xf32> to vector<16x128xbf16>
    %cst_24 = arith.constant dense<0.000000e+00> : vector<16x128xf32>
    %52 = tpu.matmul %51, %48, %cst_24 {dimension_numbers = #tpu.dot_dimension_numbers<[1], [0], [0], [1], [0, 0, 1, 1], [], []>} : vector<16x128xbf16>, vector<128x128xbf16>, vector<16x128xf32> -> vector<16x128xf32>
    %53 = vector.broadcast %50 : vector<1x128xf32> to vector<16x128xf32>
    %54 = arith.addf %52, %53 : vector<16x128xf32>
    %55 = math.tanh %54 : vector<16x128xf32>
    %56 = arith.truncf %46 : vector<16x128xf32> to vector<16x128xbf16>
    %cst_25 = arith.constant dense<0.000000e+00> : vector<16x128xf32>
    %57 = tpu.matmul %56, %48, %cst_25 {dimension_numbers = #tpu.dot_dimension_numbers<[1], [0], [0], [1], [0, 0, 1, 1], [], []>} : vector<16x128xbf16>, vector<128x128xbf16>, vector<16x128xf32> -> vector<16x128xf32>
    %58 = vector.broadcast %50 : vector<1x128xf32> to vector<16x128xf32>
    %59 = arith.addf %57, %58 : vector<16x128xf32>
    %60 = math.tanh %59 : vector<16x128xf32>
    %c0_26 = arith.constant 0 : index
    %c0_27 = arith.constant 0 : index
    %61 = vector.load %arg6[%c0_26, %c0_27] : memref<1x128xf32, #tpu.memory_space<vmem>>, vector<1x128xf32>
    %c0_28 = arith.constant 0 : index
    %c0_29 = arith.constant 0 : index
    %62 = vector.load %arg7[%c0_28, %c0_29] : memref<1x1xf32, #tpu.memory_space<vmem>>, vector<1x1xf32>
    %63 = vector.broadcast %61 : vector<1x128xf32> to vector<16x128xf32>
    %64 = arith.mulf %55, %63 : vector<16x128xf32>
    %cst_30 = arith.constant dense<0.000000e+00> : vector<16xf32>
    %65 = vector.multi_reduction <add>, %64, %cst_30 [1] : vector<16x128xf32> to vector<16xf32>
    %66 = vector.shape_cast %65 : vector<16xf32> to vector<16x1xf32>
    %67 = vector.broadcast %62 : vector<1x1xf32> to vector<16x1xf32>
    %68 = arith.addf %66, %67 : vector<16x1xf32>
    %c0_31 = arith.constant 0 : index
    %c0_32 = arith.constant 0 : index
    %69 = vector.load %arg8[%c0_31, %c0_32] : memref<32x1xf32, #tpu.memory_space<vmem>>, vector<16x1xf32>
    tpu.vector_store %arg8[%c0_31, %c0_32], %68 {strides = array<i32>} : memref<32x1xf32, #tpu.memory_space<vmem>>, vector<16x1xf32>,
    %70 = vector.broadcast %61 : vector<1x128xf32> to vector<16x128xf32>
    %71 = arith.mulf %60, %70 : vector<16x128xf32>
    %cst_33 = arith.constant dense<0.000000e+00> : vector<16xf32>
    %72 = vector.multi_reduction <add>, %71, %cst_33 [1] : vector<16x128xf32> to vector<16xf32>
    %73 = vector.shape_cast %72 : vector<16xf32> to vector<16x1xf32>
    %74 = vector.broadcast %62 : vector<1x1xf32> to vector<16x1xf32>
    %75 = arith.addf %73, %74 : vector<16x1xf32>
    %c16 = arith.constant 16 : index
    %c0_34 = arith.constant 0 : index
    %76 = vector.load %arg8[%c16, %c0_34] : memref<32x1xf32, #tpu.memory_space<vmem>>, vector<16x1xf32>
    tpu.vector_store %arg8[%c16, %c0_34], %75 {strides = array<i32>} : memref<32x1xf32, #tpu.memory_space<vmem>>, vector<16x1xf32>,
    return
  }
  func.func @transform_0(%arg0: i32) -> (i32, i32) {
    %c0_i32 = arith.constant 0 : i32
    %c0_i32_0 = arith.constant 0 : i32
    return %arg0, %c0_i32 : i32, i32
  }
  func.func @transform_1(%arg0: i32) -> (i32, i32) {
    %c0_i32 = arith.constant 0 : i32
    %c0_i32_0 = arith.constant 0 : i32
    %c0_i32_1 = arith.constant 0 : i32
    return %c0_i32, %c0_i32_0 : i32, i32
  }
  func.func @transform_2(%arg0: i32) -> (i32, i32) {
    %c0_i32 = arith.constant 0 : i32
    %c0_i32_0 = arith.constant 0 : i32
    %c0_i32_1 = arith.constant 0 : i32
    return %c0_i32, %c0_i32_0 : i32, i32
  }
  func.func @transform_3(%arg0: i32) -> (i32, i32, i32) {
    %c0_i32 = arith.constant 0 : i32
    %c0_i32_0 = arith.constant 0 : i32
    %c0_i32_1 = arith.constant 0 : i32
    %c0_i32_2 = arith.constant 0 : i32
    return %c0_i32, %c0_i32_0, %c0_i32_1 : i32, i32, i32
  }
  func.func @transform_4(%arg0: i32) -> (i32, i32, i32) {
    %c0_i32 = arith.constant 0 : i32
    %c0_i32_0 = arith.constant 0 : i32
    %c0_i32_1 = arith.constant 0 : i32
    %c0_i32_2 = arith.constant 0 : i32
    return %c0_i32, %c0_i32_0, %c0_i32_1 : i32, i32, i32
  }
  func.func @transform_5(%arg0: i32) -> (i32, i32) {
    %c0_i32 = arith.constant 0 : i32
    %c0_i32_0 = arith.constant 0 : i32
    %c0_i32_1 = arith.constant 0 : i32
    return %c0_i32, %c0_i32_0 : i32, i32
  }
  func.func @transform_6(%arg0: i32) -> (i32, i32) {
    %c0_i32 = arith.constant 0 : i32
    %c0_i32_0 = arith.constant 0 : i32
    %c0_i32_1 = arith.constant 0 : i32
    return %c0_i32, %c0_i32_0 : i32, i32
  }
  func.func @transform_7(%arg0: i32) -> (i32, i32) {
    %c0_i32 = arith.constant 0 : i32
    %c0_i32_0 = arith.constant 0 : i32
    return %arg0, %c0_i32 : i32, i32
  }
}

</mosaic_0001>

<bundles_post_ra>
// kernel: tpu_custom_call.1
= control target key start
LH: loop header
LB: loop body
LE: loop exit
PB: predicated region body
PF: predicated region fallthrough
CT: control target
= control target key end

     0   :  { %s1498_s0 = inlined_call_operand.vmem [shape: f32[64,2], index: 0, kind: input, shape index: {}]   ;;  %s1499_s1 = inlined_call_operand.vmem [shape: f32[2,128], index: 1, kind: input, shape index: {}]   ;;  %s1500_s2 = inlined_call_operand.vmem [shape: f32[1,128], index: 2, kind: input, shape index: {}]   ;;  %s1501_s3 = inlined_call_operand.hbm [shape: bf16[3,128,128], index: 3, kind: input, shape index: {}]   ;;  %s1502_s4 = inlined_call_operand.vmem [shape: f32[3,1,128], index: 4, kind: input, shape index: {}]   ;;  %s1503_s5 = inlined_call_operand.vmem [shape: f32[1,128], index: 5, kind: input, shape index: {}]   ;;  %s1504_s6 = inlined_call_operand.<no memory space> [shape: f32[1,1], index: 6, kind: input, shape index: {}]   ;;  %s1505_s7 = inlined_call_operand.vmem [shape: f32[64,1], index: 7, kind: output, shape index: {}]  }
   0x1   :  { %v12_v0 = vstv %s1504_s6 }
   0x2   :  { %13 = vst [vmem:[#allocation2] sm:$0x1] %v12_v0 }
   0x3   :  { %14 = vsyncpa [#allocation4], 0  ;;  %s1354_s26 = smov 0  }
   0x4 LB: > { %s960_s27 = sadd.s32 4294967295, %s1302_s26   ;;  %p962_p0 = scmp.ge.s32.totalorder %s1302_s26, 1  ;;  %s1302_s26 = sphi %s1354_s26, %s20_s26  }
   0x5   : > { %p203_p1 = scmp.lt.s32.totalorder %s1302_s26, 3  ;;  %s1304_s28 = smov [#allocation3]  }
   0x6   : > { %s221_s29 = sshll.u32 %s1304_s28, 4  ;;  %p1368_p3 = scmp.eq.s32.totalorder %s960_s27, 0  ;;  %s222_s29 = int_to_ptr.vmem [resolvable:$true] %s221_s29 }
   0x7   : > { %p1362_p2 = pnand %p962_p0, %p203_p1  ;;  %s1264_s11 = scalar_lea.hbm %s1501_s3, 3072 }
   0x8   : > { %s1510_s30 = scalar_select %p1368_p3, 1, 0 }
   0x9   : > { %s1509_s6 = scalar_select %p1362_p2, 1, 0 }
   0xa   : > { %p1183_p4 = pneg %p1362_p2  ;;  %p1265_p6 = scmp.ne.s32.totalorder %s1501_s3, %s1264_s11 }
   0xb   : > { %p1271_p10 = scmp.lt.u32.totalorder %s1264_s11, %s1501_s3 }
   0xc   : > { %p1376_p5 = pnand %p1368_p3, %p1183_p4 }
   0xe   : > { %p1266_p7 = pneg %p1376_p5 }
  0x10   : > { %p1267_p8 = pnand %p1266_p7, %p1265_p6 }
  0x12   : > { %p1268_p9 = pneg %p1267_p8 }
  0x14   : > { %p1273_p11 = pnand %p1271_p10, %p1268_p9 }
  0x16   : > { %1276 = shalt.err (!%p1273_p11)
}
  0x17   : > { %s1277_s16 = scalar_lea.vmem %s222_s29, 3072  ;;  %p1285_p1 = scmp.lt.s32.totalorder %s222_s29, %s222_s29 }
  0x18   : > { %p1278_p12 = scmp.ne.s32.totalorder %s222_s29, %s1277_s16  ;;  %p1286_p4 = scmp.lt.s32.totalorder %s1277_s16, %s1277_s16 }
  0x1a   : > { %p1280_p13 = pnand %p1278_p12, %p1266_p7  ;;  %p1287_p3 = por %p1286_p4, %p1285_p1 }
  0x1c   : > { %p1281_p0 = pneg %p1280_p13 }
  0x1e   : > { %p1288_p2 = pnand %p1287_p3, %p1281_p0 }
  0x20   : > { %1291 = shalt.err (!%p1288_p2)
}
  0x21   : > { %s1305_s17 = smov 64   ;;  %s1306_s18 = smov 4  }
  0x22   : > { %1186 = dma.hbm_to_vmem [thread:$0]  (!%p1376_p5), %s1501_s3, 3072, %s222_s29, [#allocation4], %s1305_s17, %s1305_s17, %s1306_s18  }
  0x23   : > { %p1512_p6 = scmp.ne.s32.totalorder %s1509_s6, 0 }
  0x24   : > { %p1513_p8 = scmp.ne.s32.totalorder (!%p1512_p6), %s1510_s30, 0 }
  0x25   : > { %255 = sbr.rel (%p1512_p6) target bundleno = 1043 (0x413), region = 48 }
  0x2c   : > { %1297 = dma.done.wait (%p1513_p8), [#allocation4], 3072  }
  0x2d   : > { %1299 = vsyncadd (%p1513_p8), [#allocation4], 4294964224  ;;  %s967_s21 = sshll.u32 %s960_s27, 2  ;;  %v1307_v1 = vmov 0   ;;  %v1308_v2 = vmov 0.0   ;;  %v1208_v7 = vld [vmem:[#allocation3] sm:$0xff]   ;;  %v326_v16 = vlaneseq }
  0x2e   : > { %1205 = vset.pattern.permute.xlu1 %v1307_v1  ;;  %1204 = vset.pattern.permute.xlu0 %v1307_v1  ;;  %p288_p2 = scmp.lt.s32.totalorder %s967_s21, 7  ;;  %v1209_v8 = vld [vmem:[#allocation3 + $0x8] sm:$0xff]   ;;  %v1210_v9 = vld [vmem:[#allocation3 + $0x10] sm:$0xff]   ;;  %v1309_v10 = vmov 1   ;;  %v1211_v11 = vld [vmem:[#allocation3 + $0x18] sm:$0xff]   ;;  %vm1310_vm0 = vmmov 0  }
  0x2f   : > { %1059 = vmatprep.subr.bf16.mxu0 %v1308_v2  ;;  %1079 = vmatprep.subr.bf16.mxu1 %v1308_v2  ;;  %v1212_v12 = vld [vmem:[#allocation3 + $0x20] sm:$0xff]   ;;  %v1213_v13 = vld [vmem:[#allocation3 + $0x28] sm:$0xff]   ;;  %v1214_v14 = vld [vmem:[#allocation3 + $0x30] sm:$0xff]   ;;  %v327_v17 = vshrl.u32 %v326_v16, 7  ;;  %vm879_vm1 = vcmask 7168  }
  0x30   : > { %s1515_s21 = smov (!%p288_p2, %s967_s21), 7  ;;  %1060 = vmatpush3.bf16.msra.mxu0 %v1208_v7  ;;  %1080 = vmatpush3.bf16.msra.mxu1 %v1208_v7  ;;  %v1215_v15 = vld [vmem:[#allocation3 + $0x38] sm:$0xff]   ;;  %v1216_v50 = vld [vmem:[#allocation3 + $0x40] sm:$0xff]   ;;  %v1217_v54 = vld [vmem:[#allocation3 + $0x48] sm:$0xff]  }
  0x31   : > { %s968_s22 = sshll.u32 %s1515_s21, 3  ;;  %1061 = vmatprep.subr.bf16.mxu0 %v1308_v2  ;;  %1081 = vmatprep.subr.bf16.mxu1 %v1308_v2  ;;  %v328_v18 = vsub.s32 0, %v327_v17  ;;  %v304_v19 = vld [vmem:[%s1499_s1] sm:$0x3]  ;;  %v362_v23 = vsub.s32 1, %v327_v17  ;;  %v1218_v56 = vld [vmem:[#allocation3 + $0x50] sm:$0xff]  }
  0x32   : > { %s291_s25 = scalar_lea.vmem %s1498_s0, %s968_s22  ;;  %1075 = vmatprep.mubr.msk.bf16.mxu0 %vm1310_vm0, %v1308_v2  ;;  %1095 = vmatprep.mubr.msk.bf16.mxu1 %vm1310_vm0, %v1308_v2  ;;  %v971_v27 = vld [vmem:[%s1500_s2] ss:$0 sm:$0xff]  ;;  %v1220_v58 = vld [vmem:[#allocation3 + $0x60] sm:$0xff]   ;;  %v1221_v59 = vld [vmem:[#allocation3 + $0x68] sm:$0xff]   ;;  %s297_s17 = scalar_lea.vmem %s1505_s7, %s968_s22 }
  0x33   : > { %v302_v3 = vld [vmem:[%s291_s25 + $0x10] sm:$0xff]  ;;  %v300_v4 = vld [vmem:[%s291_s25] sm:$0xff]  ;;  %v303_v5 = vld [vmem:[%s291_s25 + $0x18] sm:$0xff]  ;;  %v329_v22 = vrot.slane %v304_v19, %v328_v18  ;;  %v363_v29 = vrot.slane %v304_v19, %v362_v23 }
  0x34   : > { %318 = vperm.xlu1 %1205, %v302_v3   ;;  %308 = vperm.xlu0 %1204, %v300_v4   ;;  %v301_v6 = vld [vmem:[%s291_s25 + $0x8] sm:$0xff]  ;;  %v1219_v57 = vld [vmem:[#allocation3 + $0x58] sm:$0xff]   ;;  %v1222_v60 = vld [vmem:[#allocation3 + $0x70] sm:$0xff]  }
  0x35   : > { %1062 = vmatpush3.bf16.msra.mxu0 %v1209_v8  ;;  %1082 = vmatpush3.bf16.msra.mxu1 %v1209_v8  ;;  %v1223_v61 = vld [vmem:[#allocation3 + $0x78] sm:$0xff]   ;;  %v1225_v18 = vld [vmem:[#allocation3 + $0x88] sm:$0xff]  }
  0x36   : > { %1063 = vmatprep.subr.bf16.mxu0 %v1308_v2  ;;  %1083 = vmatprep.subr.bf16.mxu1 %v1308_v2  ;;  %v972_v62 = vld [vmem:[%s1502_s4] ss:$0 sm:$0xff]  ;;  %v1229_v23 = vld [vmem:[#allocation3 + $0xa8] sm:$0xff]  }
  0x38   : > { %323 = vperm.xlu1 %1205, %v303_v5   ;;  %313 = vperm.xlu0 %1204, %v301_v6  }
  0x39   : > { %1064 = vmatpush3.bf16.msra.mxu0 %v1210_v9  ;;  %1084 = vmatpush3.bf16.msra.mxu1 %v1210_v9 }
  0x3a   : > { %1065 = vmatprep.subr.bf16.mxu0 %v1308_v2  ;;  %1085 = vmatprep.subr.bf16.mxu1 %v1308_v2 }
  0x3c   : > { %1207 = vset.pattern.permute.xlu1 %v1309_v10  ;;  %1206 = vset.pattern.permute.xlu0 %v1309_v10 }
  0x3d   : > { %349 = vperm.xlu1 %1207, %v301_v6   ;;  %345 = vperm.xlu0 %1206, %v300_v4  }
  0x3e   : > { %1066 = vmatpush3.bf16.msra.mxu0 %v1211_v11  ;;  %1086 = vmatpush3.bf16.msra.mxu1 %v1211_v11 }
  0x3f   : > { %1067 = vmatprep.subr.bf16.mxu0 %v1308_v2  ;;  %1087 = vmatprep.subr.bf16.mxu1 %v1308_v2 }
  0x41   : > { %353 = vperm.xlu1 %1207, %v302_v3   ;;  %357 = vperm.xlu0 %1206, %v303_v5  }
  0x42   : > { %1068 = vmatpush3.bf16.msra.mxu0 %v1212_v12  ;;  %1088 = vmatpush3.bf16.msra.mxu1 %v1212_v12 }
  0x43   : > { %1069 = vmatprep.subr.bf16.mxu0 %v1308_v2  ;;  %1089 = vmatprep.subr.bf16.mxu1 %v1308_v2 }
  0x46   : > { %1070 = vmatpush3.bf16.msra.mxu0 %v1213_v13  ;;  %1090 = vmatpush3.bf16.msra.mxu1 %v1213_v13 }
  0x47   : > { %1071 = vmatprep.subr.bf16.mxu0 %v1308_v2  ;;  %1091 = vmatprep.subr.bf16.mxu1 %v1308_v2 }
  0x4a   : > { %1072 = vmatpush3.bf16.msra.mxu0 %v1214_v14  ;;  %1092 = vmatpush3.bf16.msra.mxu1 %v1214_v14  ;;  %v1224_v14 = vld [vmem:[#allocation3 + $0x80] sm:$0xff]  }
  0x4b   : > { %1073 = vmatprep.subr.bf16.mxu0 %v1308_v2  ;;  %1093 = vmatprep.subr.bf16.mxu1 %v1308_v2 }
  0x4e   : > { %1074 = vmatpush3.bf16.msra.mxu0 %v1215_v15  ;;  %1094 = vmatpush3.bf16.msra.mxu1 %v1215_v15 }
  0x4f   : > { %1099 = vmatprep.subr.bf16.mxu0 %v1308_v2  ;;  %1119 = vmatprep.subr.bf16.mxu1 %v1308_v2 }
  0xb3   : > { %v319_v20 = vpop.permute.xlu1 %318  ;;  %v309_v21 = vpop.permute.xlu0 %308 }
  0xb4   : > { %v330_v26 = vmul.f32 %v329_v22, %v309_v21  ;;  %v332_v30 = vmul.f32 %v329_v22, %v319_v20  ;;  %v1226_v20 = vld [vmem:[#allocation3 + $0x90] sm:$0xff]   ;;  %v1227_v21 = vld [vmem:[#allocation3 + $0x98] sm:$0xff]  }
  0xb6   : > { %v340_v31 = vadd.f32 %v971_v27, %v330_v26  ;;  %v342_v40 = vadd.f32 %v971_v27, %v332_v30  ;;  %v982_v26 = vld [vmem:[%s1502_s4 + $0x1] ss:$0 sm:$0xff] }
  0xb7   : > { %v324_v24 = vpop.permute.xlu1 %323  ;;  %v314_v25 = vpop.permute.xlu0 %313 }
  0xb8   : > { %v331_v28 = vmul.f32 %v329_v22, %v314_v25  ;;  %v333_v34 = vmul.f32 %v329_v22, %v324_v24  ;;  %v1228_v22 = vld [vmem:[#allocation3 + $0xa0] sm:$0xff]   ;;  %v1230_v24 = vld [vmem:[#allocation3 + $0xb0] sm:$0xff]   ;;  %v1231_v25 = vld [vmem:[#allocation3 + $0xb8] sm:$0xff]  }
  0xba   : > { %v341_v35 = vadd.f32 %v971_v27, %v331_v28  ;;  %v343_v43 = vadd.f32 %v971_v27, %v333_v34 }
  0xbc   : > { %v350_v32 = vpop.permute.xlu1 %349  ;;  %v346_v33 = vpop.permute.xlu0 %345 }
  0xbd   : > { %v365_v36 = vmul.f32 %v363_v29, %v350_v32  ;;  %v364_v37 = vmul.f32 %v363_v29, %v346_v33 }
  0xbf   : > { %v369_v38 = vadd.f32 %v365_v36, %v341_v35  ;;  %v368_v39 = vadd.f32 %v364_v37, %v340_v31 }
  0xc0   : > { %v354_v41 = vpop.permute.xlu1 %353  ;;  %v358_v42 = vpop.permute.xlu0 %357 }
  0xc1   : > { %1232 = vtanh.f32 %v369_v38  ;;  %v366_v44 = vmul.f32 %v363_v29, %v354_v41  ;;  %v367_v45 = vmul.f32 %v363_v29, %v358_v42 }
  0xc2   : > { %1234 = vtanh.f32 %v368_v39 }
  0xc3   : > { %v370_v46 = vadd.f32 %v366_v44, %v342_v40  ;;  %v371_v47 = vadd.f32 %v367_v45, %v343_v43  ;;  %v992_v44 = vld [vmem:[%s1502_s4 + $0x2] ss:$0 sm:$0xff] }
  0xc5   : > { %1236 = vtanh.f32 %v370_v46 }
  0xc6   : > { %1238 = vtanh.f32 %v371_v47 }
  0xcb   : > { %v1233_v48 = vpop.eup %1232 }
  0xcc   : > { %v1235_v49 = vpop.eup %1234 }
  0xcd   : > { %v393_v51 = vpack.c.bf16 %v1233_v48, %v1235_v49 }
  0xcf   : > { %v1237_v52 = vpop.eup %1236  ;;  %1076 = vmatmul.mubr.bf16.vlgmr.msra.gmra.mrb[0].mxu0 %v393_v51 }
  0xd0   : > { %v1239_v53 = vpop.eup %1238  ;;  %1100 = vmatpush3.bf16.msra.mxu0 %v1216_v50  ;;  %1115 = vmatprep.mubr.msk.bf16.mxu0 %vm1310_vm0, %v1308_v2 }
  0xd1   : > { %v491_v55 = vpack.c.bf16 %v1239_v53, %v1237_v52  ;;  %1101 = vmatprep.subr.bf16.mxu0 %v1308_v2 }
  0xd3   : > { %1096 = vmatmul.mubr.bf16.vlgmr.msra.gmra.mrb[0].mxu1 %v491_v55 }
  0xd4   : > { %1102 = vmatpush3.bf16.msra.mxu0 %v1217_v54  ;;  %1120 = vmatpush3.bf16.msra.mxu1 %v1216_v50 }
  0xd5   : > { %1103 = vmatprep.subr.bf16.mxu0 %v1308_v2  ;;  %1121 = vmatprep.subr.bf16.mxu1 %v1308_v2 }
  0xd6   : > { %1135 = vmatprep.mubr.msk.bf16.mxu1 %vm1310_vm0, %v1308_v2 }
  0xd8   : > { %1104 = vmatpush3.bf16.msra.mxu0 %v1218_v56  ;;  %1122 = vmatpush3.bf16.msra.mxu1 %v1217_v54 }
  0xd9   : > { %1105 = vmatprep.subr.bf16.mxu0 %v1308_v2  ;;  %1123 = vmatprep.subr.bf16.mxu1 %v1308_v2 }
  0xdc   : > { %1106 = vmatpush3.bf16.msra.mxu0 %v1219_v57  ;;  %1124 = vmatpush3.bf16.msra.mxu1 %v1218_v56 }
  0xdd   : > { %1107 = vmatprep.subr.bf16.mxu0 %v1308_v2  ;;  %1125 = vmatprep.subr.bf16.mxu1 %v1308_v2 }
  0xe0   : > { %1126 = vmatpush3.bf16.msra.mxu1 %v1219_v57  ;;  %1108 = vmatpush3.bf16.msra.mxu0 %v1220_v58  ;;  %v1001_v57 = vld [vmem:[%s1503_s5] ss:$0 sm:$0xff] }
  0xe1   : > { %1127 = vmatprep.subr.bf16.mxu1 %v1308_v2  ;;  %1109 = vmatprep.subr.bf16.mxu0 %v1308_v2 }
  0xe4   : > { %1128 = vmatpush3.bf16.msra.mxu1 %v1220_v58  ;;  %1110 = vmatpush3.bf16.msra.mxu0 %v1221_v59 }
  0xe5   : > { %1129 = vmatprep.subr.bf16.mxu1 %v1308_v2  ;;  %1111 = vmatprep.subr.bf16.mxu0 %v1308_v2 }
  0xe8   : > { %1130 = vmatpush3.bf16.msra.mxu1 %v1221_v59  ;;  %1112 = vmatpush3.bf16.msra.mxu0 %v1222_v60 }
  0xe9   : > { %1131 = vmatprep.subr.bf16.mxu1 %v1308_v2  ;;  %1113 = vmatprep.subr.bf16.mxu0 %v1308_v2 }
  0xec   : > { %1132 = vmatpush3.bf16.msra.mxu1 %v1222_v60  ;;  %1114 = vmatpush3.bf16.msra.mxu0 %v1223_v61 }
  0xed   : > { %1133 = vmatprep.subr.bf16.mxu1 %v1308_v2  ;;  %1139 = vmatprep.subr.bf16.mxu0 %v1308_v2 }
  0xf0   : > { %1134 = vmatpush3.bf16.msra.mxu1 %v1223_v61 }
  0xf1   : > { %1159 = vmatprep.subr.bf16.mxu1 %v1308_v2 }
 0x1a2   : > { %v482_v63 = vpop.f32.mrb[0].mxu0 }
 0x1a3   : > { %v483_v0 = vadd.f32 %v972_v62, %v482_v63  ;;  %v1077_v1 = vpop.f32.mrb[1].mxu0 }
 0x1a4   : > { %v485_v3 = vpop.f32.mrb[2].mxu0 }
 0x1a5   : > { %v486_v4 = vadd.f32 %v972_v62, %v485_v3  ;;  %v1078_v5 = vpop.f32.mrb[3].mxu0  ;;  %1240 = vtanh.f32 %v483_v0  ;;  %v1002_v3 = vld [vmem:[#allocation2] ss:$0 sm:$0xff] }
 0x1a6   : > { %v526_v6 = vpop.f32.mrb[0].mxu1 }
 0x1a7   : > { %1242 = vtanh.f32 %v486_v4  ;;  %v527_v7 = vadd.f32 %v972_v62, %v526_v6  ;;  %v1097_v8 = vpop.f32.mrb[1].mxu1 }
 0x1a8   : > { %v529_v9 = vpop.f32.mrb[2].mxu1 }
 0x1a9   : > { %v530_v10 = vadd.f32 %v972_v62, %v529_v9  ;;  %v1098_v11 = vpop.f32.mrb[3].mxu1  ;;  %1244 = vtanh.f32 %v527_v7 }
 0x1ab   : > { %1246 = vtanh.f32 %v530_v10 }
 0x1af   : > { %v1241_v12 = vpop.eup %1240 }
 0x1b1   : > { %v1243_v13 = vpop.eup %1242 }
 0x1b2   : > { %v554_v15 = vpack.c.bf16 %v1243_v13, %v1241_v12 }
 0x1b3   : > { %v1245_v16 = vpop.eup %1244 }
 0x1b4   : > { %1116 = vmatmul.mubr.bf16.vlgmr.msra.gmra.mrb[4].mxu0 %v554_v15 }
 0x1b5   : > { %v1247_v17 = vpop.eup %1246  ;;  %1140 = vmatpush3.bf16.msra.mxu0 %v1224_v14  ;;  %1155 = vmatprep.mubr.msk.bf16.mxu0 %vm1310_vm0, %v1308_v2 }
 0x1b6   : > { %v652_v19 = vpack.c.bf16 %v1247_v17, %v1245_v16  ;;  %1141 = vmatprep.subr.bf16.mxu0 %v1308_v2 }
 0x1b8   : > { %1136 = vmatmul.mubr.bf16.vlgmr.msra.gmra.mrb[4].mxu1 %v652_v19 }
 0x1b9   : > { %1142 = vmatpush3.bf16.msra.mxu0 %v1225_v18  ;;  %1160 = vmatpush3.bf16.msra.mxu1 %v1224_v14 }
 0x1ba   : > { %1143 = vmatprep.subr.bf16.mxu0 %v1308_v2  ;;  %1161 = vmatprep.subr.bf16.mxu1 %v1308_v2 }
 0x1bb   : > { %1175 = vmatprep.mubr.msk.bf16.mxu1 %vm1310_vm0, %v1308_v2 }
 0x1bd   : > { %1144 = vmatpush3.bf16.msra.mxu0 %v1226_v20  ;;  %1162 = vmatpush3.bf16.msra.mxu1 %v1225_v18 }
 0x1be   : > { %1145 = vmatprep.subr.bf16.mxu0 %v1308_v2  ;;  %1163 = vmatprep.subr.bf16.mxu1 %v1308_v2 }
 0x1c1   : > { %1146 = vmatpush3.bf16.msra.mxu0 %v1227_v21  ;;  %1164 = vmatpush3.bf16.msra.mxu1 %v1226_v20 }
 0x1c2   : > { %1147 = vmatprep.subr.bf16.mxu0 %v1308_v2  ;;  %1165 = vmatprep.subr.bf16.mxu1 %v1308_v2 }
 0x1c5   : > { %1166 = vmatpush3.bf16.msra.mxu1 %v1227_v21  ;;  %1148 = vmatpush3.bf16.msra.mxu0 %v1228_v22 }
 0x1c6   : > { %1167 = vmatprep.subr.bf16.mxu1 %v1308_v2  ;;  %1149 = vmatprep.subr.bf16.mxu0 %v1308_v2 }
 0x1c9   : > { %1168 = vmatpush3.bf16.msra.mxu1 %v1228_v22  ;;  %1150 = vmatpush3.bf16.msra.mxu0 %v1229_v23 }
 0x1ca   : > { %1169 = vmatprep.subr.bf16.mxu1 %v1308_v2  ;;  %1151 = vmatprep.subr.bf16.mxu0 %v1308_v2 }
 0x1cd   : > { %1170 = vmatpush3.bf16.msra.mxu1 %v1229_v23  ;;  %1152 = vmatpush3.bf16.msra.mxu0 %v1230_v24 }
 0x1ce   : > { %1171 = vmatprep.subr.bf16.mxu1 %v1308_v2  ;;  %1153 = vmatprep.subr.bf16.mxu0 %v1308_v2 }
 0x1d1   : > { %1172 = vmatpush3.bf16.msra.mxu1 %v1230_v24  ;;  %1154 = vmatpush3.bf16.msra.mxu0 %v1231_v25 }
 0x1d2   : > { %1173 = vmatprep.subr.bf16.mxu1 %v1308_v2 }
 0x1d5   : > { %1174 = vmatpush3.bf16.msra.mxu1 %v1231_v25 }
 0x287   : > { %v643_v27 = vpop.f32.mrb[4].mxu0 }
 0x288   : > { %v644_v28 = vadd.f32 %v982_v26, %v643_v27  ;;  %v1117_v29 = vpop.f32.mrb[5].mxu0 }
 0x289   : > { %v646_v30 = vpop.f32.mrb[6].mxu0 }
 0x28a   : > { %v647_v31 = vadd.f32 %v982_v26, %v646_v30  ;;  %v1118_v32 = vpop.f32.mrb[7].mxu0  ;;  %1248 = vtanh.f32 %v644_v28 }
 0x28b   : > { %v687_v33 = vpop.f32.mrb[4].mxu1 }
 0x28c   : > { %1250 = vtanh.f32 %v647_v31  ;;  %v688_v34 = vadd.f32 %v982_v26, %v687_v33  ;;  %v1137_v35 = vpop.f32.mrb[5].mxu1 }
 0x28d   : > { %v690_v36 = vpop.f32.mrb[6].mxu1 }
 0x28e   : > { %v691_v37 = vadd.f32 %v982_v26, %v690_v36  ;;  %v1138_v2 = vpop.f32.mrb[7].mxu1  ;;  %1252 = vtanh.f32 %v688_v34 }
 0x290   : > { %1254 = vtanh.f32 %v691_v37 }
 0x294   : > { %v1249_v38 = vpop.eup %1248 }
 0x296   : > { %v1251_v39 = vpop.eup %1250 }
 0x297   : > { %v715_v40 = vpack.c.bf16 %v1251_v39, %v1249_v38 }
 0x298   : > { %v1253_v41 = vpop.eup %1252 }
 0x299   : > { %1156 = vmatmul.mubr.bf16.vlgmr.msra.gmra.mrb[8].mxu0 %v715_v40 }
 0x29a   : > { %v1255_v42 = vpop.eup %1254 }
 0x29b   : > { %v813_v43 = vpack.c.bf16 %v1255_v42, %v1253_v41 }
 0x29d   : > { %1176 = vmatmul.mubr.bf16.vlgmr.msra.gmra.mrb[8].mxu1 %v813_v43 }
 0x36c   : > { %v804_v45 = vpop.f32.mrb[8].mxu0 }
 0x36d   : > { %v805_v46 = vadd.f32 %v992_v44, %v804_v45  ;;  %v1157_v47 = vpop.f32.mrb[9].mxu0 }
 0x36e   : > { %v807_v48 = vpop.f32.mrb[10].mxu0 }
 0x36f   : > { %1256 = vtanh.f32 %v805_v46  ;;  %v808_v49 = vadd.f32 %v992_v44, %v807_v48  ;;  %v1158_v50 = vpop.f32.mrb[11].mxu0 }
 0x370   : > { %v848_v51 = vpop.f32.mrb[8].mxu1 }
 0x371   : > { %1258 = vtanh.f32 %v808_v49  ;;  %v849_v52 = vadd.f32 %v992_v44, %v848_v51  ;;  %v1177_v53 = vpop.f32.mrb[9].mxu1 }
 0x372   : > { %v851_v54 = vpop.f32.mrb[10].mxu1 }
 0x373   : > { %1260 = vtanh.f32 %v849_v52  ;;  %v852_v55 = vadd.f32 %v992_v44, %v851_v54  ;;  %v1178_v56 = vpop.f32.mrb[11].mxu1 }
 0x375   : > { %1262 = vtanh.f32 %v852_v55 }
 0x379   : > { %v1257_v58 = vpop.eup %1256 }
 0x37a   : > { %v865_v59 = vmul.f32 %v1257_v58, %v1001_v57 }
 0x37b   : > { %v1259_v60 = vpop.eup %1258 }
 0x37c   : > { %867 = vadd.xlane.f32.xlu1 %v865_v59  ;;  %v866_v61 = vmul.f32 %v1259_v60, %v1001_v57 }
 0x37d   : > { %v1261_v62 = vpop.eup %1260 }
 0x37e   : > { %869 = vadd.xlane.f32.xlu0 %v866_v61  ;;  %v882_v0 = vmul.f32 %v1261_v62, %v1001_v57 }
 0x37f   : > { %v1263_v63 = vpop.eup %1262 }
 0x380   : > { %v883_v1 = vmul.f32 %v1263_v63, %v1001_v57 }
 0x382   : > { %884 = vadd.xlane.f32.xlu0 %v882_v0  ;;  %886 = vadd.xlane.f32.xlu1 %v883_v1 }
 0x409   : > { %v868_v4 = vpop.xlane.xlu1 %867 }
 0x40a   : > { %v877_v5 = vadd.f32 %v1002_v3, %v868_v4 }
 0x40b   : > { %v870_v6 = vpop.xlane.xlu0 %869 }
 0x40c   : > { %880 = vst.msk [vmem:[%s297_s17] sm:$0xff] %vm879_vm1, %v877_v5  ;;  %v878_v7 = vadd.f32 %v1002_v3, %v870_v6 }
 0x40e   : > { %881 = vst.msk [vmem:[%s297_s17 + $0x8] sm:$0xff] %vm879_vm1, %v878_v7 }
 0x40f   : > { %v887_v8 = vpop.xlane.xlu1 %886  ;;  %v885_v9 = vpop.xlane.xlu0 %884 }
 0x410   : > { %v889_v10 = vadd.f32 %v1002_v3, %v887_v8  ;;  %v888_v11 = vadd.f32 %v1002_v3, %v885_v9 }
 0x412   : > { %890 = vst.msk [vmem:[%s297_s17 + $0x10] sm:$0xff] %vm879_vm1, %v888_v11  ;;  %891 = vst.msk [vmem:[%s297_s17 + $0x18] sm:$0xff] %vm879_vm1, %v889_v10 }
 0x413 PF: > { %s20_s26 = sadd.s32 1, %s1302_s26  }
 0x414   : > { %p17_p3 = scmp.ge.s32.totalorder %s20_s26, 4  }
 0x416   :  { %19 = sbr.rel (!%p17_p3) target bundleno = 4 (0x4), region = 87 }
 0x41d   :  { %914 = vsyncpa [#allocation4], 1 }
 0x41e   :  { %916 = vsyncpa [#allocation4 + $0x1], 1 }

</bundles_post_ra>
